<compile_context>
chip_gen: v7x
topology: tpu7x:2x2x1
jax: 0.10.0
libtpu: 0.0.40
codegen_flags: <defaults>
</compile_context>

<pallas_src>
import functools

import numpy as np
import jax
import jax.numpy as jnp
from jax.experimental import pallas as pl
from jax.experimental.pallas import tpu as pltpu

_HALPE2LSP = (16, 14, 12, 11, 13, 15, 10, 8, 6, 5, 7, 9, 18, 17)
_LANES = 128
_SUBLANES = 8
# 3 planes * 2048 rows * 128 lanes * 4 B = 3 MiB per tile; x2 (double buffer)
# = 6 MiB -> safe under v5e's 16 MiB default scoped VMEM, v6e 32 MiB, v7x 64 MiB.
_MAX_TILE_ROWS = 2048


def _keyp_loss_kernel(denom_ref, data_ref, out_ref, acc_ref,
                      *, keyp_weight, loss_clip):
    step = pl.program_id(0)

    @pl.when(step == 0)
    def _():
        acc_ref[0, 0] = jnp.float32(0.0)

    # data_ref tile is (3, tile_rows, 128): pred / gt_xy / fused weight planes.
    pred = data_ref[0].astype(jnp.float32)
    gt = data_ref[1].astype(jnp.float32)
    w = data_ref[2].astype(jnp.float32)
    diff = pred - gt
    acc_ref[0, 0] += jnp.sum(w * diff * diff)     # padding & masked rows contribute 0

    @pl.when(step == pl.num_programs(0) - 1)
    def _():
        # 0/0 -> NaN reproduces torch's .mean() on an empty selection.
        loss = acc_ref[0, 0] / denom_ref[0, 0]
        # `if loss > 300: loss = 0` gate (NaN > 300 is False -> NaN passes through).
        loss = jnp.where(loss > loss_clip, jnp.float32(0.0), loss)
        out_ref[0, 0] = loss * keyp_weight


def keyp_loss_pallas(pred_keypoints_2d, gt_keypoints_2d, valid,
                     *, keyp_weight=10.0, loss_clip=300.0):
    """Confidence-weighted, validity-masked 2D keypoint MSE (Keyp_Loss.forward)."""
    n_kp = gt_keypoints_2d.shape[1]
    dtype = jnp.promote_types(pred_keypoints_2d.dtype, gt_keypoints_2d.dtype)

    # Static halpe->lsp selection folded into a constant keypoint mask (no gather).
    kp_mask_np = np.zeros((n_kp,), dtype=np.float32)
    kp_mask_np[list(_HALPE2LSP)] = 1.0
    kp_mask = jnp.asarray(kp_mask_np, dtype=dtype)

    pred = pred_keypoints_2d.astype(dtype)                        # [N, K, 2]
    gt_xy = gt_keypoints_2d[..., :2].astype(dtype)                # [N, K, 2]
    conf = gt_keypoints_2d[..., 2:3].astype(dtype)                # [N, K, 1]

    # NOTE: exact float compare, same as torch's `valid == 1`.
    row_valid = (valid == 1)
    row_mask = row_valid.astype(dtype)                            # [N]

    # Fused weight plane: conf * row_mask * keypoint_mask, broadcast over (x, y).
    w = conf * row_mask[:, None, None] * kp_mask[None, :, None]   # [N, K, 1]
    w = jnp.broadcast_to(w, gt_xy.shape)                          # [N, K, 2]

    # Denominator of the PyTorch mean: n_valid_rows * 14 * 2, as a (1,1) SMEM scalar.
    denom = (jnp.sum(row_valid.astype(jnp.float32))
             * float(len(_HALPE2LSP) * 2)).reshape(1, 1).astype(jnp.float32)

    # Single lane-dense stacked slab: [3, rows, 128], rows a multiple of the tile.
    n_elems = int(np.prod(gt_xy.shape))
    rows_min = pl.cdiv(max(n_elems, 1), _LANES)
    if rows_min <= _MAX_TILE_ROWS:
        tile_rows = ((rows_min + _SUBLANES - 1) // _SUBLANES) * _SUBLANES
    else:
        tile_rows = _MAX_TILE_ROWS
    rows = ((rows_min + tile_rows - 1) // tile_rows) * tile_rows
    padded_len = rows * _LANES

    slab = jnp.stack([pred.reshape(-1), gt_xy.reshape(-1), w.reshape(-1)], axis=0)
    slab = jnp.pad(slab, ((0, 0), (0, padded_len - n_elems)))
    slab = slab.reshape(3, rows, _LANES)

    grid = (rows // tile_rows,)
    itemsize = jnp.dtype(dtype).itemsize
    cost = pl.CostEstimate(
        flops=4 * padded_len + 8,
        transcendentals=0,
        bytes_accessed=3 * padded_len * itemsize + 8,
    )

    kernel = functools.partial(_keyp_loss_kernel,
                               keyp_weight=float(keyp_weight),
                               loss_clip=float(loss_clip))

    out = pl.pallas_call(
        kernel,
        out_shape=jax.ShapeDtypeStruct((1, 1), jnp.float32),
        grid=grid,
        in_specs=[
            pl.BlockSpec(memory_space=pltpu.SMEM),                       # denominator scalar
            pl.BlockSpec((3, tile_rows, _LANES), lambda i: (0, i, 0)),   # stacked data slab
        ],
        out_specs=pl.BlockSpec(memory_space=pltpu.SMEM),
        scratch_shapes=[pltpu.SMEM((1, 1), jnp.float32)],                # resident accumulator
        compiler_params=pltpu.CompilerParams(dimension_semantics=("arbitrary",)),
        cost_estimate=cost,
    )(denom, slab)
    # TODO(synk): on v7x with very large N, add a leading size-2 "parallel" axis
    # (two partial sums combined in finalize) so both TensorCores participate.
    return out[0, 0]


class KeypLoss:
    """JAX/Pallas port of Keyp_Loss."""

    def __init__(self, device=None):
        self.device = device
        self.keyp_weight = 10.0
        self.halpe2lsp = list(_HALPE2LSP)

    def __call__(self, pred_keypoints_2d, gt_keypoints_2d, valid):
        loss = keyp_loss_pallas(pred_keypoints_2d, gt_keypoints_2d, valid,
                                keyp_weight=self.keyp_weight)
        return {'keyp_Loss': loss}


if __name__ == "__main__":
    key = jax.random.PRNGKey(0)
    k1, k2, k3, k4 = jax.random.split(key, 4)

    n_people = 8     # flattened batch * num_people axis
    n_halpe = 26     # full Halpe keypoint set (halpe2lsp selects 14 of them)

    pred_kp2d = jax.random.normal(k1, (n_people, n_halpe, 2), jnp.float32)
    gt_xy = jax.random.normal(k2, (n_people, n_halpe, 2), jnp.float32)
    gt_conf = jax.random.uniform(k3, (n_people, n_halpe, 1), jnp.float32)
    gt_kp2d = jnp.concatenate([gt_xy, gt_conf], axis=-1)      # [..., (x, y, conf)]
    valid = (jax.random.uniform(k4, (n_people,)) > 0.3).astype(jnp.float32)
    valid = valid.at[0].set(1.0)   # ensure at least one valid row

    loss_mod = KeypLoss()
    loss_dict = loss_mod(pred_kp2d, gt_kp2d, valid)
    keyp_loss = jax.block_until_ready(loss_dict['keyp_Loss'])

    # Pure-numpy reference reproducing the PyTorch forward exactly.
    p_np = np.asarray(pred_kp2d)
    g_np = np.asarray(gt_kp2d)
    v_np = np.asarray(valid)
    sel = v_np == 1
    p = p_np[sel][:, list(_HALPE2LSP)]
    g = g_np[sel][:, list(_HALPE2LSP)]
    c = g[:, :, -1:]
    ref = float((c * (p - g[:, :, :-1]) ** 2).mean())
    ref = 0.0 if ref > 300.0 else ref
    ref *= 10.0

    assert np.isclose(float(keyp_loss), ref, rtol=1e-5, atol=1e-6), (float(keyp_loss), ref)
    print("KERNEL_OK")
</pallas_src>

<mosaic_0001>
module attributes {stable_mosaic.version = 11 : i64} {
  func.func @_keyp_loss_kernel(%arg0: i32, %arg1: memref<1x1xf32, #tpu.memory_space<smem>>, %arg2: memref<3x8x128xf32, #tpu.memory_space<vmem>>, %arg3: memref<1x1xf32, #tpu.memory_space<smem>>, %arg4: memref<1x1xf32, #tpu.memory_space<smem>>) attributes {dimension_semantics = [#tpu.dimension_semantics<arbitrary>], iteration_bounds = array<i64: 1>, scalar_prefetch = 0 : i64, scratch_operands = 1 : i64, tpu.core_type = #tpu.core_type<tc>, window_params = [{transform_indices = @transform_0, window_bounds = array<i64: 1, 1>}, {transform_indices = @transform_1, window_bounds = array<i64: 3, 8, 128>}, {transform_indices = @transform_2, window_bounds = array<i64: 1, 1>}]} {
    %c0_i32 = arith.constant 0 : i32
    %0 = arith.cmpi eq, %arg0, %c0_i32 : i32
    %1 = arith.extui %0 : i1 to i32
    %c0_i32_0 = arith.constant 0 : i32
    %2 = arith.cmpi ne, %1, %c0_i32_0 : i32
    scf.if %2 {
      %cst_13 = arith.constant 0.000000e+00 : f32
      %c0_14 = arith.constant 0 : index
      %c0_15 = arith.constant 0 : index
      %22 = memref.load %arg4[%c0_14, %c0_15] : memref<1x1xf32, #tpu.memory_space<smem>>
      memref.store %cst_13, %arg4[%c0_14, %c0_15] : memref<1x1xf32, #tpu.memory_space<smem>>
    } else {
    }
    %c0 = arith.constant 0 : index
    %c0_1 = arith.constant 0 : index
    %c0_2 = arith.constant 0 : index
    %3 = vector.load %arg2[%c0, %c0_1, %c0_2] : memref<3x8x128xf32, #tpu.memory_space<vmem>>, vector<1x8x128xf32>
    %4 = vector.shape_cast %3 : vector<1x8x128xf32> to vector<8x128xf32>
    %c1 = arith.constant 1 : index
    %c0_3 = arith.constant 0 : index
    %c0_4 = arith.constant 0 : index
    %5 = vector.load %arg2[%c1, %c0_3, %c0_4] : memref<3x8x128xf32, #tpu.memory_space<vmem>>, vector<1x8x128xf32>
    %6 = vector.shape_cast %5 : vector<1x8x128xf32> to vector<8x128xf32>
    %c2 = arith.constant 2 : index
    %c0_5 = arith.constant 0 : index
    %c0_6 = arith.constant 0 : index
    %7 = vector.load %arg2[%c2, %c0_5, %c0_6] : memref<3x8x128xf32, #tpu.memory_space<vmem>>, vector<1x8x128xf32>
    %8 = vector.shape_cast %7 : vector<1x8x128xf32> to vector<8x128xf32>
    %9 = arith.subf %4, %6 : vector<8x128xf32>
    %c0_7 = arith.constant 0 : index
    %c0_8 = arith.constant 0 : index
    %10 = memref.load %arg4[%c0_7, %c0_8] : memref<1x1xf32, #tpu.memory_space<smem>>
    %11 = arith.mulf %8, %9 : vector<8x128xf32>
    %12 = arith.mulf %11, %9 : vector<8x128xf32>
    %13 = vector.shape_cast %12 : vector<8x128xf32> to vector<1x8x128xf32>
    %cst = arith.constant dense<0.000000e+00> : vector<1xf32>
    %14 = vector.multi_reduction <add>, %13, %cst [1, 2] : vector<1x8x128xf32> to vector<1xf32>
    %15 = vector.shape_cast %14 : vector<1xf32> to vector<1x1x1xf32>
    %16 = vector.extract %15[0, 0, 0] : f32 from vector<1x1x1xf32>
    %17 = arith.addf %10, %16 : f32
    %c0_9 = arith.constant 0 : index
    %c0_10 = arith.constant 0 : index
    %18 = memref.load %arg4[%c0_9, %c0_10] : memref<1x1xf32, #tpu.memory_space<smem>>
    memref.store %17, %arg4[%c0_9, %c0_10] : memref<1x1xf32, #tpu.memory_space<smem>>
    %c0_i32_11 = arith.constant 0 : i32
    %19 = arith.cmpi eq, %arg0, %c0_i32_11 : i32
    %20 = arith.extui %19 : i1 to i32
    %c0_i32_12 = arith.constant 0 : i32
    %21 = arith.cmpi ne, %20, %c0_i32_12 : i32
    scf.if %21 {
      %c0_13 = arith.constant 0 : index
      %c0_14 = arith.constant 0 : index
      %22 = memref.load %arg4[%c0_13, %c0_14] : memref<1x1xf32, #tpu.memory_space<smem>>
      %c0_15 = arith.constant 0 : index
      %c0_16 = arith.constant 0 : index
      %23 = memref.load %arg1[%c0_15, %c0_16] : memref<1x1xf32, #tpu.memory_space<smem>>
      %24 = arith.divf %22, %23 : f32
      %cst_17 = arith.constant 3.000000e+02 : f32
      %25 = arith.cmpf ogt, %24, %cst_17 : f32
      %cst_18 = arith.constant 0.000000e+00 : f32
      %26 = arith.select %25, %cst_18, %24 : f32
      %cst_19 = arith.constant 1.000000e+01 : f32
      %27 = arith.mulf %26, %cst_19 : f32
      %c0_20 = arith.constant 0 : index
      %c0_21 = arith.constant 0 : index
      %28 = memref.load %arg3[%c0_20, %c0_21] : memref<1x1xf32, #tpu.memory_space<smem>>
      memref.store %27, %arg3[%c0_20, %c0_21] : memref<1x1xf32, #tpu.memory_space<smem>>
    } else {
    }
    return
  }
  func.func @transform_0(%arg0: i32) -> (i32, i32) {
    %c0_i32 = arith.constant 0 : i32
    %c0_i32_0 = arith.constant 0 : i32
    %c0_i32_1 = arith.constant 0 : i32
    return %c0_i32, %c0_i32_0 : i32, i32
  }
  func.func @transform_1(%arg0: i32) -> (i32, i32, i32) {
    %c0_i32 = arith.constant 0 : i32
    %c0_i32_0 = arith.constant 0 : i32
    %c0_i32_1 = arith.constant 0 : i32
    return %c0_i32, %arg0, %c0_i32_0 : i32, i32, i32
  }
  func.func @transform_2(%arg0: i32) -> (i32, i32) {
    %c0_i32 = arith.constant 0 : i32
    %c0_i32_0 = arith.constant 0 : i32
    %c0_i32_1 = arith.constant 0 : i32
    return %c0_i32, %c0_i32_0 : i32, i32
  }
}

</mosaic_0001>

<bundles_post_ra>
// kernel: tpu_custom_call.1
= control target key start
LH: loop header
LB: loop body
LE: loop exit
PB: predicated region body
PF: predicated region fallthrough
CT: control target
= control target key end

     0   :  { %8 = vsyncpa [#allocation5], 0  ;;  %s174_s0 = inlined_call_operand.<no memory space> [shape: f32[1,1], index: 0, kind: input, shape index: {}]   ;;  %s175_s1 = inlined_call_operand.hbm [shape: f32[3,8,128], index: 1, kind: input, shape index: {}]   ;;  %s176_s2 = inlined_call_operand.hbm [shape: f32[1,1], index: 2, kind: output, shape index: {}]  }
   0x1   :  { %9 = vsyncpa [#allocation6], 0  ;;  %s128_s9 = smov [#allocation4]   ;;  %s92_s13 = scalar_lea.hbm %s175_s1, 384 }
   0x2   :  { %s17_s10 = sshll.u32 %s128_s9, 4  ;;  %p93_p0 = scmp.ne.s32.totalorder %s175_s1, %s92_s13  ;;  %s18_s10 = int_to_ptr.vmem [resolvable:$true] %s17_s10 }
   0x3   :  { %p96_p1 = scmp.lt.u32.totalorder %s92_s13, %s175_s1 }
   0x5   :  { %p98_p2 = pnand %p96_p1, %p93_p0 }
   0x7   :  { %101 = shalt.err (!%p98_p2)
}
   0x8   :  { %s102_s18 = scalar_lea.vmem %s18_s10, 384  ;;  %p107_p4 = scmp.lt.s32.totalorder %s18_s10, %s18_s10 }
   0x9   :  { %p103_p3 = scmp.ne.s32.totalorder %s18_s10, %s102_s18  ;;  %p108_p5 = scmp.lt.s32.totalorder %s102_s18, %s102_s18 }
   0xb   :  { %p109_p6 = por %p108_p5, %p107_p4 }
   0xd   :  { %p110_p7 = pnand %p109_p6, %p103_p3 }
   0xf   :  { %113 = shalt.err (!%p110_p7)
}
  0x10   :  { %s129_s19 = smov 128   ;;  %s130_s20 = smov 8  }
  0x11   :  { %23 = dma.hbm_to_vmem [thread:$0]  %s175_s1, 384, %s18_s10, [#allocation5], %s129_s19, %s129_s19, %s130_s20  }
  0x12   :  { %124 = dma.done.wait [#allocation5], 384  }
  0x13   :  { %125 = vsyncadd [#allocation5], 4294966912  ;;  %v33_v0 = vld [vmem:[#allocation4] sm:$0xff]  ;;  %v35_v1 = vld [vmem:[#allocation4 + $0x8] sm:$0xff]  ;;  %v59_v6 = vstv %s174_s0  ;;  %s114_s29 = scalar_lea.hbm %s176_s2, 16 }
  0x14   :  { %v37_v2 = vld [vmem:[#allocation4 + $0x10] sm:$0xff]  ;;  %v38_v3 = vsub.f32 %v33_v0, %v35_v1  ;;  %90 = vrcp.f32 %v59_v6  ;;  %p115_p9 = scmp.ne.s32.totalorder %s176_s2, %s114_s29  ;;  %p118_p10 = scmp.lt.u32.totalorder %s114_s29, %s176_s2 }
  0x16   :  { %v40_v4 = vmul.f32 %v38_v3, %v37_v2  ;;  %p120_p11 = pnand %p118_p10, %p115_p9 }
  0x18   :  { %v41_v5 = vmul.f32 %v40_v4, %v38_v3 }
  0x1a   :  { %42 = vadd.xlane.f32.xlu0 %v41_v5 }
  0x1e   :  { %v91_v13 = vpop.eup %90 }
  0xa7   :  { %v43_v7 = vpop.xlane.xlu0 %42 }
  0xa8   :  { %v44_v8 = vrot.slane %v43_v7, 4 }
  0xaa   :  { %v45_v9 = vadd.f32 %v44_v8, %v43_v7 }
  0xac   :  { %v46_v10 = vrot.slane %v45_v9, 2 }
  0xae   :  { %v47_v11 = vadd.f32 %v46_v10, %v45_v9 }
  0xb0   :  { %v48_v12 = vrot.slane %v47_v11, 1 }
  0xb2   :  { %v49_v14 = vadd.f32 %v48_v12, %v47_v11 }
  0xb4   :  { %82 = vpush %v49_v14 }
  0xb5   :  { %84 = vpush %v91_v13 }
  0xe5   :  { %s83_s1 = spop %82 }
  0xe6   :  { %s85_s25 = spop %84 }
  0xe7   :  { %s62_s26 = smul.f32 %s85_s25, %s83_s1 }
  0xe9   :  { %p63_p8 = scmp.gt.f32.partialorder %s62_s26, 300.0 }
  0xeb   :  { %s178_s26 = smov (%p63_p8, %s62_s26), 0.0 }
  0xec   :  { %s65_s27 = smul.f32 10.0, %s178_s26 }
  0xee   :  { %67 = sst [smem:[#allocation7]] %s65_s27 }
  0xef   :  { %123 = shalt.err (!%p120_p11)
}
  0xf0   :  { %s131_s6 = smov [#allocation7]  }
  0xf1   :  { %75 = dma.smem_to_hbm %s131_s6, 16, %s176_s2, [#allocation6]  }
  0xf2   :  { %126 = dma.done.wait [#allocation6], 16  }
  0xf3   :  { %127 = vsyncadd [#allocation6], 4294967280 }
  0xf4   :  { %79 = sfence }
  0xf5   :  { %80 = vsyncpa [#allocation5], 1 }
  0xf6   :  { %81 = vsyncpa [#allocation6], 1 }

</bundles_post_ra>
